<compile_context>
chip_gen: v5e
topology: v5e:2x2
jax: 0.10.0
libtpu: 0.0.40
codegen_flags: <defaults>
</compile_context>

<pallas_src>
import jax
import jax.numpy as jnp
from jax.experimental import pallas as pl
from jax.experimental.pallas import tpu as pltpu

_LANE = 128      # lane width: last dim of every block should be a multiple
_SUBLANE = 8     # sublane width: second-to-last dim multiple


def _round_up(x, m):
    return (x + m - 1) // m * m


def _wrapper_mlp_kernel(x_ref, w1_ref, b1_ref, w2_ref, b2_ref, o_ref):
    # Fused: h = relu(x @ w1 + b1); y = h @ w2 + b2
    # x/w1/w2 are bf16 (MXU-native); accumulation + elementwise math in f32.
    x = x_ref[...]
    h = jnp.dot(x, w1_ref[...], preferred_element_type=jnp.float32)
    h = jnp.maximum(h + b1_ref[...], 0.0)          # f32 bias-add + ReLU (VPU)
    h = h.astype(w2_ref.dtype)                     # back to bf16 for the MXU
    y = jnp.dot(h, w2_ref[...], preferred_element_type=jnp.float32)
    o_ref[...] = (y + b2_ref[...]).astype(o_ref.dtype)


def wrapper_model_forward(x, w1, b1, w2, b2, *, block_m=256):
    """WrapperModel.forward(x) = inner_model(x); inner = Linear->ReLU->Linear.

    x:  (batch, in_f)    w1: (in_f, hidden)   b1: (hidden,) or (1, hidden)
                         w2: (hidden, out_f)  b2: (out_f,)  or (1, out_f)
    Returns (batch, out_f) float32.
    """
    batch, in_f = x.shape
    hidden = w1.shape[1]
    out_f = w2.shape[1]

    b1 = b1.reshape(1, hidden)
    b2 = b2.reshape(1, out_f)

    # ---- Pad feature dims to lane multiples (128).  Exact: padded x columns
    # hit zero w1 rows; padded hidden lanes get bias 0 -> relu(0)=0 -> multiply
    # zero w2 rows; padded output lanes are sliced off at the end.
    in_p = _round_up(in_f, _LANE)
    hid_p = _round_up(hidden, _LANE)
    out_p = _round_up(out_f, _LANE)

    # ---- Batch tile: big enough to amortize the ~0.35 us/step overhead, small
    # enough to fit comfortably in VMEM on every generation (incl. v7x 64 MiB).
    tm = min(block_m, _round_up(batch, _SUBLANE))
    batch_p = _round_up(batch, tm)
    grid_m = batch_p // tm

    # bf16 activations/weights (MXU-native, half the HBM/VMEM bytes),
    # f32 biases so the elementwise path stays in f32.
    x_p = jnp.zeros((batch_p, in_p), jnp.bfloat16).at[:batch, :in_f].set(
        x.astype(jnp.bfloat16))
    w1_p = jnp.zeros((in_p, hid_p), jnp.bfloat16).at[:in_f, :hidden].set(
        w1.astype(jnp.bfloat16))
    w2_p = jnp.zeros((hid_p, out_p), jnp.bfloat16).at[:hidden, :out_f].set(
        w2.astype(jnp.bfloat16))
    b1_p = jnp.zeros((1, hid_p), jnp.float32).at[:, :hidden].set(
        b1.astype(jnp.float32))
    b2_p = jnp.zeros((1, out_p), jnp.float32).at[:, :out_f].set(
        b2.astype(jnp.float32))

    flops = 2 * batch_p * in_p * hid_p + 2 * batch_p * hid_p * out_p
    bytes_accessed = (x_p.size + w1_p.size + w2_p.size) * 2 \
        + (b1_p.size + b2_p.size) * 4 + batch_p * out_p * 4

    y_p = pl.pallas_call(
        _wrapper_mlp_kernel,
        out_shape=jax.ShapeDtypeStruct((batch_p, out_p), jnp.float32),
        grid=(grid_m,),
        in_specs=[
            # x: tiled over batch -> software-pipelined (prefetch i+1 while
            # computing i, write back i-1).
            pl.BlockSpec((tm, in_p), lambda i: (i, 0)),
            # Weights / biases: same block every grid step -> VMEM-resident,
            # DMA'd from HBM exactly once.
            pl.BlockSpec((in_p, hid_p), lambda i: (0, 0)),
            pl.BlockSpec((1, hid_p), lambda i: (0, 0)),
            pl.BlockSpec((hid_p, out_p), lambda i: (0, 0)),
            pl.BlockSpec((1, out_p), lambda i: (0, 0)),
        ],
        out_specs=pl.BlockSpec((tm, out_p), lambda i: (i, 0)),
        compiler_params=pltpu.CompilerParams(
            # Batch tiles are independent: lets Mosaic shard them across the
            # 2 TensorCores on v7x (harmless 1-TC loop on v5e/v6e).
            dimension_semantics=("parallel",),
            # Headroom for the double-buffered tiles + resident weights.
            vmem_limit_bytes=64 << 20,
        ),
        cost_estimate=pl.CostEstimate(
            flops=flops, transcendentals=0, bytes_accessed=bytes_accessed),
    )(x_p, w1_p, b1_p, w2_p, b2_p)

    return y_p[:batch, :out_f]


if __name__ == "__main__":
    # Deterministic synthetic parameters + input (no checkpoint loading).
    key = jax.random.PRNGKey(0)
    k_x, k_w1, k_b1, k_w2, k_b2 = jax.random.split(key, 5)

    # Deliberately lane-unaligned logical shapes; the wrapper pads to 128 and
    # tiles the batch into 256-row blocks (grid=(2,)), exercising the pipeline.
    batch, in_f, hidden, out_f = 512, 100, 192, 40

    x = jax.random.normal(k_x, (batch, in_f), dtype=jnp.float32)
    w1 = jax.random.normal(k_w1, (in_f, hidden), dtype=jnp.float32) * 0.1
    b1 = jax.random.normal(k_b1, (hidden,), dtype=jnp.float32) * 0.1
    w2 = jax.random.normal(k_w2, (hidden, out_f), dtype=jnp.float32) * 0.1
    b2 = jax.random.normal(k_b2, (out_f,), dtype=jnp.float32) * 0.1

    y = wrapper_model_forward(x, w1, b1, w2, b2, block_m=256)
    jax.block_until_ready(y)

    # Reference check (pure JAX, f32 math on the same bf16-quantized params) —
    # the exact math WrapperModel delegates to its inner model.
    xq = x.astype(jnp.bfloat16).astype(jnp.float32)
    w1q = w1.astype(jnp.bfloat16).astype(jnp.float32)
    w2q = w2.astype(jnp.bfloat16).astype(jnp.float32)
    y_ref = jnp.maximum(xq @ w1q + b1[None, :], 0.0) @ w2q + b2[None, :]

    assert y.shape == (batch, out_f)
    assert jnp.allclose(y, y_ref, atol=2e-2, rtol=2e-2), "mismatch vs reference"

    print("KERNEL_OK")
</pallas_src>

<mosaic_0001>
module attributes {stable_mosaic.version = 11 : i64} {
  func.func @_wrapper_mlp_kernel(%arg0: i32, %arg1: memref<256x128xbf16, #tpu.memory_space<vmem>>, %arg2: memref<128x256xbf16, #tpu.memory_space<vmem>>, %arg3: memref<1x256xf32, #tpu.memory_space<vmem>>, %arg4: memref<256x128xbf16, #tpu.memory_space<vmem>>, %arg5: memref<1x128xf32, #tpu.memory_space<vmem>>, %arg6: memref<256x128xf32, #tpu.memory_space<vmem>>) attributes {dimension_semantics = [#tpu.dimension_semantics<parallel>], iteration_bounds = array<i64: 2>, scalar_prefetch = 0 : i64, scratch_operands = 0 : i64, tpu.core_type = #tpu.core_type<tc>, window_params = [{transform_indices = @transform_0, window_bounds = array<i64: 256, 128>}, {pipeline_mode = #tpu.pipeline_mode<synchronous>, transform_indices = @transform_1, window_bounds = array<i64: 128, 256>}, {pipeline_mode = #tpu.pipeline_mode<synchronous>, transform_indices = @transform_2, window_bounds = array<i64: 1, 256>}, {pipeline_mode = #tpu.pipeline_mode<synchronous>, transform_indices = @transform_3, window_bounds = array<i64: 256, 128>}, {pipeline_mode = #tpu.pipeline_mode<synchronous>, transform_indices = @transform_4, window_bounds = array<i64: 1, 128>}, {transform_indices = @transform_5, window_bounds = array<i64: 256, 128>}]} {
    %c0 = arith.constant 0 : index
    %c0_0 = arith.constant 0 : index
    %0 = vector.load %arg1[%c0, %c0_0] : memref<256x128xbf16, #tpu.memory_space<vmem>>, vector<256x128xbf16>
    %c0_1 = arith.constant 0 : index
    %c0_2 = arith.constant 0 : index
    %1 = vector.load %arg2[%c0_1, %c0_2] : memref<128x256xbf16, #tpu.memory_space<vmem>>, vector<128x256xbf16>
    %cst = arith.constant dense<0.000000e+00> : vector<256x256xf32>
    %2 = tpu.matmul %0, %1, %cst {dimension_numbers = #tpu.dot_dimension_numbers<[1], [0], [0], [1], [0, 0, 1, 1], [], []>} : vector<256x128xbf16>, vector<128x256xbf16>, vector<256x256xf32> -> vector<256x256xf32>
    %c0_3 = arith.constant 0 : index
    %c0_4 = arith.constant 0 : index
    %3 = vector.load %arg3[%c0_3, %c0_4] : memref<1x256xf32, #tpu.memory_space<vmem>>, vector<1x256xf32>
    %4 = vector.broadcast %3 : vector<1x256xf32> to vector<256x256xf32>
    %5 = arith.addf %2, %4 : vector<256x256xf32>
    %cst_5 = arith.constant 0.000000e+00 : f32
    %6 = vector.broadcast %cst_5 : f32 to vector<256x256xf32>
    %7 = arith.maximumf %5, %6 : vector<256x256xf32>
    %8 = arith.truncf %7 : vector<256x256xf32> to vector<256x256xbf16>
    %c0_6 = arith.constant 0 : index
    %c0_7 = arith.constant 0 : index
    %9 = vector.load %arg4[%c0_6, %c0_7] : memref<256x128xbf16, #tpu.memory_space<vmem>>, vector<256x128xbf16>
    %cst_8 = arith.constant dense<0.000000e+00> : vector<256x128xf32>
    %10 = tpu.matmul %8, %9, %cst_8 {dimension_numbers = #tpu.dot_dimension_numbers<[1], [0], [0], [1], [0, 0, 1, 1], [], []>} : vector<256x256xbf16>, vector<256x128xbf16>, vector<256x128xf32> -> vector<256x128xf32>
    %c0_9 = arith.constant 0 : index
    %c0_10 = arith.constant 0 : index
    %11 = vector.load %arg5[%c0_9, %c0_10] : memref<1x128xf32, #tpu.memory_space<vmem>>, vector<1x128xf32>
    %12 = vector.broadcast %11 : vector<1x128xf32> to vector<256x128xf32>
    %13 = arith.addf %10, %12 : vector<256x128xf32>
    %c0_11 = arith.constant 0 : index
    %c0_12 = arith.constant 0 : index
    %14 = vector.load %arg6[%c0_11, %c0_12] : memref<256x128xf32, #tpu.memory_space<vmem>>, vector<256x128xf32>
    tpu.vector_store %arg6[%c0_11, %c0_12], %13 {strides = array<i32>} : memref<256x128xf32, #tpu.memory_space<vmem>>, vector<256x128xf32>,
    return
  }
  func.func @transform_0(%arg0: i32) -> (i32, i32) {
    %c0_i32 = arith.constant 0 : i32
    %c0_i32_0 = arith.constant 0 : i32
    return %arg0, %c0_i32 : i32, i32
  }
  func.func @transform_1(%arg0: i32) -> (i32, i32) {
    %c0_i32 = arith.constant 0 : i32
    %c0_i32_0 = arith.constant 0 : i32
    %c0_i32_1 = arith.constant 0 : i32
    return %c0_i32, %c0_i32_0 : i32, i32
  }
  func.func @transform_2(%arg0: i32) -> (i32, i32) {
    %c0_i32 = arith.constant 0 : i32
    %c0_i32_0 = arith.constant 0 : i32
    %c0_i32_1 = arith.constant 0 : i32
    return %c0_i32, %c0_i32_0 : i32, i32
  }
  func.func @transform_3(%arg0: i32) -> (i32, i32) {
    %c0_i32 = arith.constant 0 : i32
    %c0_i32_0 = arith.constant 0 : i32
    %c0_i32_1 = arith.constant 0 : i32
    return %c0_i32, %c0_i32_0 : i32, i32
  }
  func.func @transform_4(%arg0: i32) -> (i32, i32) {
    %c0_i32 = arith.constant 0 : i32
    %c0_i32_0 = arith.constant 0 : i32
    %c0_i32_1 = arith.constant 0 : i32
    return %c0_i32, %c0_i32_0 : i32, i32
  }
  func.func @transform_5(%arg0: i32) -> (i32, i32) {
    %c0_i32 = arith.constant 0 : i32
    %c0_i32_0 = arith.constant 0 : i32
    return %arg0, %c0_i32 : i32, i32
  }
}

</mosaic_0001>

<bundles_post_ra>
// kernel: tpu_custom_call.1
= control target key start
LH: loop header
LB: loop body
LE: loop exit
PB: predicated region body
PF: predicated region fallthrough
CT: control target
= control target key end

     0   :  { %10 = vsyncpa [#allocation3], 0  ;;  %s2163_s0 = inlined_call_operand.hbm [shape: bf16[512,128], index: 0, kind: input, shape index: {}]   ;;  %s2164_s1 = inlined_call_operand.hbm [shape: bf16[128,256], index: 1, kind: input, shape index: {}]   ;;  %s2165_s2 = inlined_call_operand.hbm [shape: f32[1,256], index: 2, kind: input, shape index: {}]   ;;  %s2166_s3 = inlined_call_operand.hbm [shape: bf16[256,128], index: 3, kind: input, shape index: {}]   ;;  %s2167_s4 = inlined_call_operand.vmem [shape: f32[1,128], index: 4, kind: input, shape index: {}]   ;;  %s2168_s5 = inlined_call_operand.hbm [shape: f32[512,128], index: 5, kind: output, shape index: {}]  }
   0x1   :  { %12 = vsyncpa [#allocation3 + $0x1], 0 }
   0x2   :  { %13 = vsyncpa [#allocation6], 0 }
   0x3   :  { %14 = vsyncpa [#allocation9], 0 }
   0x4   :  { %15 = vsyncpa [#allocation4], 0 }
   0x5   :  { %17 = vsyncpa [#allocation4 + $0x1], 0  ;;  %s1840_s18 = smov 0   ;;  %s1842_s19 = smov 0  }
   0x6   :  { %s1844_s20 = smov 0   ;;  %s1846_s21 = smov 0  }
   0x7 LB: > { %s1861_s22 = sadd.s32 4294967295, %s1799_s21   ;;  %s1259_s23 = sadd.s32 4294967294, %s1799_s21   ;;  %s1799_s21 = sphi %s1846_s21, %s2181_s21   ;;  %s1795_s20 = sphi %s1844_s20, %s2180_s20   ;;  %s1791_s19 = sphi %s1842_s19, %s2179_s19   ;;  %s1787_s18 = sphi %s1840_s18, %s2178_s18  }
   0x8   : > { %p43_p0 = scmp.ne.s32.totalorder %s1791_s19, %s1787_s18  ;;  %p44_p1 = scmp.eq.s32.totalorder %s1861_s22, 0 }
   0x9   : > { %p151_p2 = scmp.eq.s32.totalorder %s1861_s22, 1  ;;  %p157_p3 = scmp.eq.s32.totalorder %s1259_s23, 1 }
   0xa   : > { %p1870_p4 = por %p44_p1, %p43_p0  ;;  %p1260_p5 = scmp.ge.s32.totalorder %s1799_s21, 1 }
   0xb   : > { %p1875_p6 = por %p157_p3, %p43_p0  ;;  %p164_p7 = scmp.lt.s32.totalorder %s1799_s21, 3 }
   0xc   : > { %s175_s28 = sshll.u32 %s2164_s1, 4  ;;  %s1801_s30 = smov [#allocation5]   ;;  %s176_s28 = int_to_ptr.hbm [resolvable:$true] %s175_s28 }
   0xd   : > { %p1883_p8 = pnand %p1260_p5, %p164_p7  ;;  %s177_s6 = sshll.u32 %s1801_s30, 4  ;;  %s178_s6 = int_to_ptr.vmem [resolvable:$true] %s177_s6 }
   0xe   : > { %s190_s10 = sshll.u32 %s2165_s2, 4  ;;  %s1802_s11 = smov 128   ;;  %s191_s10 = int_to_ptr.hbm [resolvable:$true] %s190_s10 }
   0xf   : > { %p1537_p9 = pneg %p1883_p8  ;;  %s1803_s12 = smov 8  }
  0x10   : > { %s1804_s13 = smov [#allocation7]   ;;  %s201_s17 = sshll.u32 %s2166_s3, 4  ;;  %s202_s17 = int_to_ptr.hbm [resolvable:$true] %s201_s17 }
  0x11   : > { %p1891_p10 = pnand %p1537_p9, %p44_p1  ;;  %s192_s14 = sshll.u32 %s1804_s13, 4  ;;  %s193_s14 = int_to_ptr.vmem [resolvable:$true] %s192_s14 }
  0x12   : > { %s1805_s23 = smov [#allocation8]   ;;  %s2169_s27 = smov 64  }
  0x13   : > { %1540 = dma.hbm_to_vmem [thread:$0]  (!%p1891_p10), %s176_s28, 2048, %s178_s6, [#allocation6], %s1802_s11, %s1802_s11, %s1803_s12  }
  0x14   : > { %1543 = dma.hbm_to_vmem [thread:$0]  (!%p1891_p10), %s191_s10, 32, %s193_s14, [#allocation6]  }
  0x15   : > { %s203_s26 = sshll.u32 %s1805_s23, 4  ;;  %s1807_s28 = smov 4   ;;  %s204_s26 = int_to_ptr.vmem [resolvable:$true] %s203_s26 }
  0x16   : > { %1546 = dma.hbm_to_vmem [thread:$0]  (!%p1891_p10), %s202_s17, 2048, %s204_s26, [#allocation9], %s2169_s27, %s2169_s27, %s1807_s28  }
  0x17   : > { %s1912_s30 = sadd.s32 1, %s1799_s21   ;;  %s30_s8 = sadd.s32 1, %s1795_s20 }
  0x18   : > { %s27_s6 = ssub.s32 %s1799_s21, %s1912_s30  ;;  %p37_p13 = scmp.ne.s32.totalorder %s1795_s20, %s1791_s19 }
  0x19   : > { %p28_p12 = scmp.eq.s32.totalorder %s27_s6, 0  ;;  %p38_p0 = scmp.eq.s32.totalorder %s1799_s21, 0 }
  0x1a   : > { %p1925_p3 = por %p151_p2, %p37_p13  ;;  %p1558_p5 = scmp.lt.s32.totalorder %s1799_s21, 2 }
  0x1b   : > { %s1921_s9 = scalar_select %p28_p12, %s1795_s20, %s30_s8  }
  0x1c   : > { %s220_s7 = sand.u32 1, %s1795_s20   ;;  %s1471_s11 = sshll.u32 %s1799_s21, 7 }
  0x1d   : > { %p39_p7 = por %p38_p0, %p37_p13  ;;  %s1265_s12 = sshll.u32 %s220_s7, 7 }
  0x1e   : > { %s229_s15 = scalar_lea.hbm %s2163_s0, %s1471_s11  ;;  %s224_s17 = scalar_lea.vmem [#allocation2], %s1265_s12 }
  0x1f   : > { %s230_s16 = sshll.u32 %s229_s15, 4  ;;  %s232_s23 = sshll.u32 %s224_s17, 4  ;;  %s231_s16 = int_to_ptr.hbm [resolvable:$true] %s230_s16  ;;  %s233_s23 = int_to_ptr.vmem [resolvable:$true] %s232_s23 }
  0x20   : > { %p1935_p9 = pnand %p1558_p5, %p39_p7  ;;  %s221_s6 = scalar_lea.sflag [#allocation3], %s220_s7 }
  0x21   : > { %s1695_s8 = sshra.s32 %s231_s16, 4  ;;  %s1702_s12 = scalar_lea.hbm %s2163_s0, 256  ;;  %s1696_s8 = int_to_ptr.hbm [resolvable:$true] %s1695_s8 }
  0x22   : > { %s1697_s27 = scalar_lea.hbm %s1696_s8, 128  ;;  %p1699_p10 = pneg %p1935_p9 }
  0x23   : > { %p1698_p2 = scmp.ne.s32.totalorder %s1696_s8, %s1697_s27  ;;  %p1703_p0 = scmp.lt.s32.totalorder %s1696_s8, %s2163_s0 }
  0x24   : > { %p1704_p5 = scmp.lt.s32.totalorder %s1702_s12, %s1697_s27 }
  0x25   : > { %p1700_p12 = pnand %p1699_p10, %p1698_p2 }
  0x26   : > { %p1705_p7 = por %p1704_p5, %p1703_p0 }
  0x27   : > { %p1701_p13 = pneg %p1700_p12 }
  0x29   : > { %p1706_p11 = pnand %p1705_p7, %p1701_p13 }
  0x2b   : > { %1709 = shalt.err (!%p1706_p11)
}
  0x2c   : > { %s2176_s7 = smov 64   ;;  %244 = sbr.rel (%p1883_p8) target bundleno = 616 (0x268), region = 40 }
  0x2d   : > { %1550 = dma.hbm_to_vmem [thread:$0]  (!%p1935_p9), %s231_s16, 2048, %s233_s23, %s221_s6, %s2176_s7, %s2176_s7, %s1807_s28  }
  0x2e   : > { %s1955_s17 = sand.u32 (!%p1883_p8), 1, %s1791_s19  }
  0x2f   : > { %s1269_s8 = sshll.u32 (!%p1883_p8), %s1955_s17, 7  ;;  %s247_s27 = scalar_lea.sflag (!%p1883_p8), [#allocation3], %s1955_s17 }
  0x30   : > { %s1959_s11 = scalar_lea.vmem (!%p1883_p8), [#allocation2], %s1269_s8 }
  0x31   : > { %1770 = dma.done.wait (%p1870_p4), %s247_s27, 2048  }
  0x32   : > { %1772 = vsyncadd (%p1870_p4), %s247_s27, 4294965248 }
  0x33   : > { %1774 = dma.done.wait (%p44_p1), [#allocation6], 2080  }
  0x34   : > { %1776 = vsyncadd (%p44_p1), [#allocation6], 4294965216 }
  0x35   : > { %1778 = dma.done.wait (%p44_p1), [#allocation9], 2048  }
  0x36   : > { %1780 = vsyncadd (%p44_p1), [#allocation9], 4294965248  ;;  %v1396_v0 = vld [vmem:[#allocation5 + $0x70] sm:$0xf]  ;;  %v1503_v1 = vld [vmem:[#allocation5 + $0x74] sm:$0xf0] }
  0x37   : > { %v1502_v2 = vld [vmem:[#allocation5 + $0x74] sm:$0xf]  ;;  %v1397_v3 = vor.u32 %v1503_v1, %v1396_v0  ;;  %v1398_v4 = vld [vmem:[#allocation5 + $0x78] sm:$0xf0]  ;;  %v1388_v5 = vld [vmem:[#allocation5 + $0x60] sm:$0xf] }
  0x38   : > { %v1501_v6 = vld [vmem:[#allocation5 + $0x64] sm:$0xf0]  ;;  %v1401_v7 = vor.u32 %v1502_v2, %v1398_v4  ;;  %v1500_v8 = vld [vmem:[#allocation5 + $0x64] sm:$0xf]  ;;  %v1390_v9 = vld [vmem:[#allocation5 + $0x68] sm:$0xf0] }
  0x39   : > { %525 = vmatpush.bf16.msra.mxu0 %v1397_v3  ;;  %v1389_v10 = vor.u32 %v1501_v6, %v1388_v5  ;;  %v1393_v11 = vor.u32 %v1500_v8, %v1390_v9  ;;  %v1380_v12 = vld [vmem:[#allocation5 + $0x50] sm:$0xf]  ;;  %v1499_v13 = vld [vmem:[#allocation5 + $0x54] sm:$0xf0]  ;;  %v1498_v14 = vld [vmem:[#allocation5 + $0x54] sm:$0xf] }
  0x3a   : > { %614 = vmatpush.bf16.msra.mxu1 %v1401_v7  ;;  %v1382_v15 = vld [vmem:[#allocation5 + $0x58] sm:$0xf0]  ;;  %v1381_v16 = vor.u32 %v1499_v13, %v1380_v12  ;;  %v1372_v18 = vld [vmem:[#allocation5 + $0x40] sm:$0xf]  ;;  %v1497_v19 = vld [vmem:[#allocation5 + $0x44] sm:$0xf0] }
  0x3b   : > { %v1385_v17 = vor.u32 %v1498_v14, %v1382_v15  ;;  %v1496_v20 = vld [vmem:[#allocation5 + $0x44] sm:$0xf]  ;;  %v1374_v21 = vld [vmem:[#allocation5 + $0x48] sm:$0xf0]  ;;  %v1373_v22 = vor.u32 %v1497_v19, %v1372_v18  ;;  %v1364_v24 = vld [vmem:[#allocation5 + $0x30] sm:$0xf] }
  0x3c   : > { %v1377_v23 = vor.u32 %v1496_v20, %v1374_v21  ;;  %v1495_v25 = vld [vmem:[#allocation5 + $0x34] sm:$0xf0]  ;;  %v1494_v26 = vld [vmem:[#allocation5 + $0x34] sm:$0xf]  ;;  %v1366_v27 = vld [vmem:[#allocation5 + $0x38] sm:$0xf0] }
  0x3d   : > { %526 = vmatpush.bf16.msra.mxu0 %v1389_v10  ;;  %v1365_v28 = vor.u32 %v1495_v25, %v1364_v24  ;;  %v1369_v29 = vor.u32 %v1494_v26, %v1366_v27  ;;  %v1356_v30 = vld [vmem:[#allocation5 + $0x20] sm:$0xf]  ;;  %v1493_v31 = vld [vmem:[#allocation5 + $0x24] sm:$0xf0]  ;;  %v1492_v32 = vld [vmem:[#allocation5 + $0x24] sm:$0xf] }
  0x3e   : > { %615 = vmatpush.bf16.msra.mxu1 %v1393_v11  ;;  %v1358_v33 = vld [vmem:[#allocation5 + $0x28] sm:$0xf0]  ;;  %v1357_v34 = vor.u32 %v1493_v31, %v1356_v30  ;;  %v1348_v36 = vld [vmem:[#allocation5 + $0x10] sm:$0xf]  ;;  %v1491_v37 = vld [vmem:[#allocation5 + $0x14] sm:$0xf0] }
  0x3f   : > { %v1361_v35 = vor.u32 %v1492_v32, %v1358_v33  ;;  %v1490_v38 = vld [vmem:[#allocation5 + $0x14] sm:$0xf]  ;;  %v1350_v39 = vld [vmem:[#allocation5 + $0x18] sm:$0xf0]  ;;  %v1349_v40 = vor.u32 %v1491_v37, %v1348_v36  ;;  %v1340_v42 = vld [vmem:[#allocation5] sm:$0xf] }
  0x40   : > { %v1353_v41 = vor.u32 %v1490_v38, %v1350_v39  ;;  %v1489_v43 = vld [vmem:[#allocation5 + $0x4] sm:$0xf0]  ;;  %v1488_v44 = vld [vmem:[#allocation5 + $0x4] sm:$0xf]  ;;  %v1342_v45 = vld [vmem:[#allocation5 + $0x8] sm:$0xf0] }
  0x41   : > { %527 = vmatpush.bf16.msra.mxu0 %v1381_v16  ;;  %v1341_v46 = vor.u32 %v1489_v43, %v1340_v42  ;;  %v1345_v47 = vor.u32 %v1488_v44, %v1342_v45  ;;  %v1472_v48 = vld [vmem:[%s1959_s11] sm:$0xff]  ;;  %v1473_v49 = vld [vmem:[%s1959_s11 + $0x8] sm:$0xff]  ;;  %v1474_v50 = vld [vmem:[%s1959_s11 + $0x10] sm:$0xff]  ;;  %s1273_s28 = sshll.u32 %s1955_s17, 8  ;;  %s1520_s23 = sshll.u32 %s1861_s22, 8 }
  0x42   : > { %616 = vmatpush.bf16.msra.mxu1 %v1385_v17  ;;  %v1475_v51 = vld [vmem:[%s1959_s11 + $0x18] sm:$0xff]  ;;  %v1476_v52 = vld [vmem:[%s1959_s11 + $0x20] sm:$0xff]  ;;  %v1477_v55 = vld [vmem:[%s1959_s11 + $0x28] sm:$0xff]  ;;  %s2037_s16 = scalar_lea.vmem [#allocation10], %s1273_s28  ;;  %s1153_s13 = scalar_lea.hbm %s2168_s5, %s1520_s23 }
  0x43   : > { %v1511_v53 = vld [vmem:[#allocation8 + $0x38] sm:$0xff]  ;;  %v1510_v56 = vld [vmem:[#allocation8 + $0x30] sm:$0xff]  ;;  %v1509_v58 = vld [vmem:[#allocation8 + $0x28] sm:$0xff]  ;;  %s1154_s12 = sshll.u32 %s2037_s16, 4  ;;  %s1156_s14 = sshll.u32 %s1153_s13, 4  ;;  %s1155_s12 = int_to_ptr.vmem [resolvable:$true] %s1154_s12  ;;  %s1157_s14 = int_to_ptr.hbm [resolvable:$true] %s1156_s14 }
  0x44   : > { %v1519_v54 = vld [vmem:[#allocation8 + $0x78] sm:$0xff]  ;;  %931 = vmatpush.bf16.msra.mxu2 %v1511_v53  ;;  %v1518_v57 = vld [vmem:[#allocation8 + $0x70] sm:$0xff]  ;;  %v1517_v59 = vld [vmem:[#allocation8 + $0x68] sm:$0xff]  ;;  %s1142_s15 = scalar_lea.sflag [#allocation4], %s1955_s17  ;;  %s1739_s7 = sshra.s32 %s1157_s14, 4  ;;  %s1740_s7 = int_to_ptr.hbm [resolvable:$true] %s1739_s7 }
  0x45   : > { %528 = vmatpush.bf16.msra.mxu0 %v1373_v22  ;;  %1020 = vmatpush.bf16.msra.mxu3 %v1519_v54  ;;  %v1508_v60 = vld [vmem:[#allocation8 + $0x20] sm:$0xff]  ;;  %v1478_v62 = vld [vmem:[%s1959_s11 + $0x30] sm:$0xff]  ;;  %v1507_v63 = vld [vmem:[#allocation8 + $0x18] sm:$0xff]  ;;  %s1741_s22 = scalar_lea.hbm %s1740_s7, 256  ;;  %p1746_p11 = scmp.lt.s32.totalorder %s1740_s7, %s2168_s5 }
  0x46   : > { %617 = vmatpush.bf16.msra.mxu1 %v1377_v23  ;;  %v1516_v61 = vld [vmem:[#allocation8 + $0x60] sm:$0xff]  ;;  %v1515_v0 = vld [vmem:[#allocation8 + $0x58] sm:$0xff]  ;;  %v1506_v1 = vld [vmem:[#allocation8 + $0x10] sm:$0xff]  ;;  %p1742_p1 = scmp.ne.s32.totalorder %s1740_s7, %s1741_s22 }
  0x47   : > { %v1514_v2 = vld [vmem:[#allocation8 + $0x50] sm:$0xff]  ;;  %v1505_v3 = vld [vmem:[#allocation8 + $0x8] sm:$0xff]  ;;  %v1504_v5 = vld [vmem:[#allocation8] sm:$0xff] }
  0x48   : > { %932 = vmatpush.bf16.msra.mxu2 %v1510_v56  ;;  %v1513_v4 = vld [vmem:[#allocation8 + $0x48] sm:$0xff]  ;;  %v1512_v6 = vld [vmem:[#allocation8 + $0x40] sm:$0xff]  ;;  %v1479_v7 = vld [vmem:[%s1959_s11 + $0x38] sm:$0xff]  ;;  %p1743_p4 = pnand %p1742_p1, %p1925_p3 }
  0x49   : > { %529 = vmatpush.bf16.msra.mxu0 %v1365_v28  ;;  %1021 = vmatpush.bf16.msra.mxu3 %v1518_v57  ;;  %v1480_v8 = vld [vmem:[%s1959_s11 + $0x40] sm:$0xff]  ;;  %v1481_v26 = vld [vmem:[%s1959_s11 + $0x48] sm:$0xff]  ;;  %v1483_v56 = vld [vmem:[%s1959_s11 + $0x58] sm:$0xff] }
  0x4a   : > { %618 = vmatpush.bf16.msra.mxu1 %v1369_v29  ;;  %v343_v9 = vld [vmem:[#allocation7] sm:$0x3]  ;;  %p1744_p8 = pneg %p1743_p4 }
  0x4b   : > { %v1982_v12 = vperm.slane %v343_v9, 0  ;;  %v1984_v13 = vperm.slane %v343_v9, 1 }
  0x4c   : > { %933 = vmatpush.bf16.msra.mxu2 %v1509_v58 }
  0x4d   : > { %530 = vmatpush.bf16.msra.mxu0 %v1357_v34  ;;  %1022 = vmatpush.bf16.msra.mxu3 %v1517_v59 }
  0x4e   : > { %619 = vmatpush.bf16.msra.mxu1 %v1361_v35 }
  0x50   : > { %934 = vmatpush.bf16.msra.mxu2 %v1508_v60 }
  0x51   : > { %531 = vmatpush.bf16.msra.mxu0 %v1349_v40  ;;  %1023 = vmatpush.bf16.msra.mxu3 %v1516_v61 }
  0x52   : > { %620 = vmatpush.bf16.msra.mxu1 %v1353_v41  ;;  %v1482_v41 = vld [vmem:[%s1959_s11 + $0x50] sm:$0xff] }
  0x54   : > { %935 = vmatpush.bf16.msra.mxu2 %v1507_v63 }
  0x55   : > { %532 = vmatpush.bf16.msra.mxu0 %v1341_v46  ;;  %1024 = vmatpush.bf16.msra.mxu3 %v1515_v0 }
  0x56   : > { %621 = vmatpush.bf16.msra.mxu1 %v1345_v47 }
  0x58   : > { %533 = vmatmul.bf16.vlgmr.msra.gmra.mxu0 %v1472_v48  ;;  %936 = vmatpush.bf16.msra.mxu2 %v1506_v1 }
  0x59   : > { %622 = vmatmul.bf16.vlgmr.msra.gmra.mxu1 %v1472_v48  ;;  %1025 = vmatpush.bf16.msra.mxu3 %v1514_v2 }
  0x5c   : > { %937 = vmatpush.bf16.msra.mxu2 %v1505_v3 }
  0x5d   : > { %1026 = vmatpush.bf16.msra.mxu3 %v1513_v4 }
  0x60   : > { %938 = vmatpush.bf16.msra.mxu2 %v1504_v5 }
  0x61   : > { %1027 = vmatpush.bf16.msra.mxu3 %v1512_v6 }
  0x68   : > { %538 = vmatmul.bf16.gmra.mxu0 %v1473_v49 }
  0x69   : > { %627 = vmatmul.bf16.gmra.mxu1 %v1473_v49 }
  0x78   : > { %543 = vmatmul.bf16.gmra.mxu0 %v1474_v50 }
  0x79   : > { %632 = vmatmul.bf16.gmra.mxu1 %v1474_v50 }
  0x88   : > { %548 = vmatmul.bf16.gmra.mxu0 %v1475_v51 }
  0x89   : > { %637 = vmatmul.bf16.gmra.mxu1 %v1475_v51 }
  0x98   : > { %553 = vmatmul.bf16.gmra.mxu0 %v1476_v52 }
  0x99   : > { %642 = vmatmul.bf16.gmra.mxu1 %v1476_v52 }
  0xa8   : > { %558 = vmatmul.bf16.gmra.mxu0 %v1477_v55 }
  0xa9   : > { %647 = vmatmul.bf16.gmra.mxu1 %v1477_v55 }
  0xb8   : > { %563 = vmatmul.bf16.gmra.mxu0 %v1478_v62 }
  0xb9   : > { %652 = vmatmul.bf16.gmra.mxu1 %v1478_v62 }
  0xc8   : > { %568 = vmatmul.bf16.gmra.mxu0 %v1479_v7 }
  0xc9   : > { %657 = vmatmul.bf16.gmra.mxu1 %v1479_v7  ;;  %v1484_v7 = vld [vmem:[%s1959_s11 + $0x60] sm:$0xff] }
  0xd5   : > { %v534_v10 = vpop.f32.mrf.mxu0 }
  0xd6   : > { %v623_v11 = vpop.f32.mrf.mxu1  ;;  %v535_v14 = vadd.f32 %v534_v10, %v1982_v12 }
  0xd7   : > { %v624_v15 = vadd.f32 %v623_v11, %v1984_v13 }
  0xd8   : > { %573 = vmatmul.bf16.gmra.mxu0 %v1480_v8  ;;  %v703_v20 = vmax.f32 %v535_v14, 0.0 }
  0xd9   : > { %662 = vmatmul.bf16.gmra.mxu1 %v1480_v8  ;;  %v704_v22 = vmax.f32 %v624_v15, 0.0 }
  0xdd   : > { %v536_v16 = vpop.f32.mrf.mxu0 }
  0xde   : > { %v537_v17 = vadd.f32 %v536_v16, %v1982_v12  ;;  %v625_v18 = vpop.f32.mrf.mxu1 }
  0xdf   : > { %v626_v19 = vadd.f32 %v625_v18, %v1984_v13 }
  0xe0   : > { %v705_v21 = vmax.f32 %v537_v17, 0.0 }
  0xe1   : > { %v706_v23 = vmax.f32 %v626_v19, 0.0 }
  0xe2   : > { %v767_v24 = vpack.c.bf16 %v705_v21, %v703_v20 }
  0xe3   : > { %v768_v25 = vpack.c.bf16 %v706_v23, %v704_v22 }
  0xe4   : > { %939 = vmatmul.bf16.vlgmr.msra.gmra.mxu2 %v767_v24  ;;  %v1485_v24 = vld [vmem:[%s1959_s11 + $0x68] sm:$0xff] }
  0xe5   : > { %1028 = vmatmul.bf16.vlgmr.msra.gmra.mxu3 %v768_v25  ;;  %v539_v27 = vpop.f32.mrf.mxu0 }
  0xe6   : > { %v628_v28 = vpop.f32.mrf.mxu1  ;;  %v540_v29 = vadd.f32 %v539_v27, %v1982_v12 }
  0xe7   : > { %v629_v30 = vadd.f32 %v628_v28, %v1984_v13 }
  0xe8   : > { %578 = vmatmul.bf16.gmra.mxu0 %v1481_v26  ;;  %v707_v35 = vmax.f32 %v540_v29, 0.0 }
  0xe9   : > { %667 = vmatmul.bf16.gmra.mxu1 %v1481_v26  ;;  %v708_v37 = vmax.f32 %v629_v30, 0.0 }
  0xed   : > { %v541_v31 = vpop.f32.mrf.mxu0 }
  0xee   : > { %v542_v32 = vadd.f32 %v541_v31, %v1982_v12  ;;  %v630_v33 = vpop.f32.mrf.mxu1 }
  0xef   : > { %v631_v34 = vadd.f32 %v630_v33, %v1984_v13 }
  0xf0   : > { %v709_v36 = vmax.f32 %v542_v32, 0.0 }
  0xf1   : > { %v710_v38 = vmax.f32 %v631_v34, 0.0 }
  0xf2   : > { %v769_v39 = vpack.c.bf16 %v709_v36, %v707_v35 }
  0xf3   : > { %v770_v40 = vpack.c.bf16 %v710_v38, %v708_v37 }
  0xf4   : > { %944 = vmatmul.bf16.gmra.mxu2 %v769_v39  ;;  %v1486_v39 = vld [vmem:[%s1959_s11 + $0x70] sm:$0xff] }
  0xf5   : > { %1033 = vmatmul.bf16.gmra.mxu3 %v770_v40  ;;  %v544_v42 = vpop.f32.mrf.mxu0 }
  0xf6   : > { %v633_v43 = vpop.f32.mrf.mxu1  ;;  %v545_v44 = vadd.f32 %v544_v42, %v1982_v12 }
  0xf7   : > { %v634_v45 = vadd.f32 %v633_v43, %v1984_v13 }
  0xf8   : > { %583 = vmatmul.bf16.gmra.mxu0 %v1482_v41  ;;  %v711_v50 = vmax.f32 %v545_v44, 0.0 }
  0xf9   : > { %672 = vmatmul.bf16.gmra.mxu1 %v1482_v41  ;;  %v712_v52 = vmax.f32 %v634_v45, 0.0 }
  0xfd   : > { %v546_v46 = vpop.f32.mrf.mxu0 }
  0xfe   : > { %v547_v47 = vadd.f32 %v546_v46, %v1982_v12  ;;  %v635_v48 = vpop.f32.mrf.mxu1 }
  0xff   : > { %v636_v49 = vadd.f32 %v635_v48, %v1984_v13 }
 0x100   : > { %v713_v51 = vmax.f32 %v547_v47, 0.0 }
 0x101   : > { %v714_v53 = vmax.f32 %v636_v49, 0.0 }
 0x102   : > { %v771_v54 = vpack.c.bf16 %v713_v51, %v711_v50 }
 0x103   : > { %v772_v55 = vpack.c.bf16 %v714_v53, %v712_v52 }
 0x104   : > { %949 = vmatmul.bf16.gmra.mxu2 %v771_v54  ;;  %v1487_v54 = vld [vmem:[%s1959_s11 + $0x78] sm:$0xff]  ;;  %s1745_s11 = scalar_lea.hbm %s2168_s5, 512 }
 0x105   : > { %1038 = vmatmul.bf16.gmra.mxu3 %v772_v55  ;;  %v549_v57 = vpop.f32.mrf.mxu0  ;;  %p1747_p9 = scmp.lt.s32.totalorder %s1745_s11, %s1741_s22 }
 0x106   : > { %v638_v58 = vpop.f32.mrf.mxu1  ;;  %v550_v59 = vadd.f32 %v549_v57, %v1982_v12 }
 0x107   : > { %v639_v60 = vadd.f32 %v638_v58, %v1984_v13  ;;  %p1748_p2 = por %p1747_p9, %p1746_p11 }
 0x108   : > { %588 = vmatmul.bf16.gmra.mxu0 %v1483_v56  ;;  %v715_v1 = vmax.f32 %v550_v59, 0.0 }
 0x109   : > { %677 = vmatmul.bf16.gmra.mxu1 %v1483_v56  ;;  %v716_v3 = vmax.f32 %v639_v60, 0.0  ;;  %p1749_p10 = pnand %p1748_p2, %p1744_p8 }
 0x10d   : > { %v551_v61 = vpop.f32.mrf.mxu0 }
 0x10e   : > { %v552_v62 = vadd.f32 %v551_v61, %v1982_v12  ;;  %v640_v63 = vpop.f32.mrf.mxu1 }
 0x10f   : > { %v641_v0 = vadd.f32 %v640_v63, %v1984_v13 }
 0x110   : > { %v717_v2 = vmax.f32 %v552_v62, 0.0 }
 0x111   : > { %v718_v4 = vmax.f32 %v641_v0, 0.0 }
 0x112   : > { %v773_v5 = vpack.c.bf16 %v717_v2, %v715_v1 }
 0x113   : > { %v774_v6 = vpack.c.bf16 %v718_v4, %v716_v3 }
 0x114   : > { %954 = vmatmul.bf16.gmra.mxu2 %v773_v5 }
 0x115   : > { %1043 = vmatmul.bf16.gmra.mxu3 %v774_v6  ;;  %v554_v8 = vpop.f32.mrf.mxu0 }
 0x116   : > { %v643_v9 = vpop.f32.mrf.mxu1  ;;  %v555_v10 = vadd.f32 %v554_v8, %v1982_v12 }
 0x117   : > { %v644_v11 = vadd.f32 %v643_v9, %v1984_v13 }
 0x118   : > { %593 = vmatmul.bf16.gmra.mxu0 %v1484_v7  ;;  %v719_v18 = vmax.f32 %v555_v10, 0.0 }
 0x119   : > { %682 = vmatmul.bf16.gmra.mxu1 %v1484_v7  ;;  %v720_v20 = vmax.f32 %v644_v11, 0.0 }
 0x11d   : > { %v556_v14 = vpop.f32.mrf.mxu0 }
 0x11e   : > { %v557_v15 = vadd.f32 %v556_v14, %v1982_v12  ;;  %v645_v16 = vpop.f32.mrf.mxu1 }
 0x11f   : > { %v646_v17 = vadd.f32 %v645_v16, %v1984_v13 }
 0x120   : > { %v721_v19 = vmax.f32 %v557_v15, 0.0 }
 0x121   : > { %v722_v21 = vmax.f32 %v646_v17, 0.0 }
 0x122   : > { %v775_v22 = vpack.c.bf16 %v721_v19, %v719_v18 }
 0x123   : > { %v776_v23 = vpack.c.bf16 %v722_v21, %v720_v20  ;;  %v2032_v21 = vld [vmem:[%s2167_s4] ss:$0 sm:$0xff] }
 0x124   : > { %959 = vmatmul.bf16.gmra.mxu2 %v775_v22 }
 0x125   : > { %1048 = vmatmul.bf16.gmra.mxu3 %v776_v23  ;;  %v559_v25 = vpop.f32.mrf.mxu0 }
 0x126   : > { %v648_v26 = vpop.f32.mrf.mxu1  ;;  %v560_v27 = vadd.f32 %v559_v25, %v1982_v12 }
 0x127   : > { %v649_v28 = vadd.f32 %v648_v26, %v1984_v13 }
 0x128   : > { %598 = vmatmul.bf16.gmra.mxu0 %v1485_v24  ;;  %v723_v33 = vmax.f32 %v560_v27, 0.0 }
 0x129   : > { %687 = vmatmul.bf16.gmra.mxu1 %v1485_v24  ;;  %v724_v35 = vmax.f32 %v649_v28, 0.0 }
 0x12d   : > { %v561_v29 = vpop.f32.mrf.mxu0 }
 0x12e   : > { %v562_v30 = vadd.f32 %v561_v29, %v1982_v12  ;;  %v650_v31 = vpop.f32.mrf.mxu1 }
 0x12f   : > { %v651_v32 = vadd.f32 %v650_v31, %v1984_v13 }
 0x130   : > { %v725_v34 = vmax.f32 %v562_v30, 0.0 }
 0x131   : > { %v726_v36 = vmax.f32 %v651_v32, 0.0 }
 0x132   : > { %v777_v37 = vpack.c.bf16 %v725_v34, %v723_v33 }
 0x133   : > { %v778_v38 = vpack.c.bf16 %v726_v36, %v724_v35 }
 0x134   : > { %964 = vmatmul.bf16.gmra.mxu2 %v777_v37 }
 0x135   : > { %1053 = vmatmul.bf16.gmra.mxu3 %v778_v38  ;;  %v564_v40 = vpop.f32.mrf.mxu0 }
 0x136   : > { %v653_v41 = vpop.f32.mrf.mxu1  ;;  %v565_v42 = vadd.f32 %v564_v40, %v1982_v12 }
 0x137   : > { %v654_v43 = vadd.f32 %v653_v41, %v1984_v13 }
 0x138   : > { %603 = vmatmul.bf16.gmra.mxu0 %v1486_v39  ;;  %v727_v48 = vmax.f32 %v565_v42, 0.0 }
 0x139   : > { %692 = vmatmul.bf16.gmra.mxu1 %v1486_v39  ;;  %v728_v50 = vmax.f32 %v654_v43, 0.0 }
 0x13d   : > { %v566_v44 = vpop.f32.mrf.mxu0 }
 0x13e   : > { %v567_v45 = vadd.f32 %v566_v44, %v1982_v12  ;;  %v655_v46 = vpop.f32.mrf.mxu1 }
 0x13f   : > { %v656_v47 = vadd.f32 %v655_v46, %v1984_v13 }
 0x140   : > { %v729_v49 = vmax.f32 %v567_v45, 0.0 }
 0x141   : > { %v730_v51 = vmax.f32 %v656_v47, 0.0 }
 0x142   : > { %v779_v52 = vpack.c.bf16 %v729_v49, %v727_v48 }
 0x143   : > { %v780_v53 = vpack.c.bf16 %v730_v51, %v728_v50 }
 0x144   : > { %969 = vmatmul.bf16.gmra.mxu2 %v779_v52 }
 0x145   : > { %1058 = vmatmul.bf16.gmra.mxu3 %v780_v53  ;;  %v569_v55 = vpop.f32.mrf.mxu0 }
 0x146   : > { %v658_v56 = vpop.f32.mrf.mxu1  ;;  %v570_v57 = vadd.f32 %v569_v55, %v1982_v12 }
 0x147   : > { %v659_v58 = vadd.f32 %v658_v56, %v1984_v13 }
 0x148   : > { %608 = vmatmul.bf16.gmra.mxu0 %v1487_v54  ;;  %v731_v63 = vmax.f32 %v570_v57, 0.0 }
 0x149   : > { %697 = vmatmul.bf16.gmra.mxu1 %v1487_v54  ;;  %v732_v1 = vmax.f32 %v659_v58, 0.0 }
 0x14d   : > { %v571_v59 = vpop.f32.mrf.mxu0 }
 0x14e   : > { %v572_v60 = vadd.f32 %v571_v59, %v1982_v12  ;;  %v660_v61 = vpop.f32.mrf.mxu1 }
 0x14f   : > { %v661_v62 = vadd.f32 %v660_v61, %v1984_v13 }
 0x150   : > { %v733_v0 = vmax.f32 %v572_v60, 0.0 }
 0x151   : > { %v734_v2 = vmax.f32 %v661_v62, 0.0 }
 0x152   : > { %v781_v3 = vpack.c.bf16 %v733_v0, %v731_v63 }
 0x153   : > { %v782_v4 = vpack.c.bf16 %v734_v2, %v732_v1 }
 0x154   : > { %974 = vmatmul.bf16.gmra.mxu2 %v781_v3 }
 0x155   : > { %1063 = vmatmul.bf16.gmra.mxu3 %v782_v4  ;;  %v574_v5 = vpop.f32.mrf.mxu0 }
 0x156   : > { %v663_v6 = vpop.f32.mrf.mxu1  ;;  %v575_v7 = vadd.f32 %v574_v5, %v1982_v12 }
 0x157   : > { %v664_v8 = vadd.f32 %v663_v6, %v1984_v13 }
 0x158   : > { %v735_v15 = vmax.f32 %v575_v7, 0.0 }
 0x159   : > { %v736_v17 = vmax.f32 %v664_v8, 0.0 }
 0x15d   : > { %v576_v9 = vpop.f32.mrf.mxu0 }
 0x15e   : > { %v577_v10 = vadd.f32 %v576_v9, %v1982_v12  ;;  %v665_v11 = vpop.f32.mrf.mxu1 }
 0x15f   : > { %v666_v14 = vadd.f32 %v665_v11, %v1984_v13 }
 0x160   : > { %v737_v16 = vmax.f32 %v577_v10, 0.0 }
 0x161   : > { %v738_v18 = vmax.f32 %v666_v14, 0.0 }
 0x162   : > { %v783_v19 = vpack.c.bf16 %v737_v16, %v735_v15 }
 0x163   : > { %v784_v20 = vpack.c.bf16 %v738_v18, %v736_v17 }
 0x164   : > { %979 = vmatmul.bf16.gmra.mxu2 %v783_v19 }
 0x165   : > { %1068 = vmatmul.bf16.gmra.mxu3 %v784_v20  ;;  %v579_v22 = vpop.f32.mrf.mxu0 }
 0x166   : > { %v668_v23 = vpop.f32.mrf.mxu1  ;;  %v580_v28 = vadd.f32 %v579_v22, %v1982_v12 }
 0x167   : > { %v940_v24 = vpop.f32.mrf.mxu2  ;;  %v669_v29 = vadd.f32 %v668_v23, %v1984_v13 }
 0x168   : > { %v941_v25 = vadd.f32 %v2032_v21, %v940_v24  ;;  %v1029_v26 = vpop.f32.mrf.mxu3  ;;  %v739_v35 = vmax.f32 %v580_v28, 0.0 }
 0x169   : > { %v740_v39 = vmax.f32 %v669_v29, 0.0 }
 0x16a   : > { %v1030_v27 = vadd.f32 %v1029_v26, %v941_v25 }
 0x16c   : > { %1109 = vst [vmem:[%s2037_s16] sm:$0xff] %v1030_v27 }
 0x16d   : > { %v581_v30 = vpop.f32.mrf.mxu0 }
 0x16e   : > { %v582_v31 = vadd.f32 %v581_v30, %v1982_v12  ;;  %v670_v32 = vpop.f32.mrf.mxu1 }
 0x16f   : > { %v671_v33 = vadd.f32 %v670_v32, %v1984_v13  ;;  %v942_v34 = vpop.f32.mrf.mxu2 }
 0x170   : > { %v741_v36 = vmax.f32 %v582_v31, 0.0  ;;  %v943_v37 = vadd.f32 %v2032_v21, %v942_v34  ;;  %v1031_v38 = vpop.f32.mrf.mxu3 }
 0x171   : > { %v742_v40 = vmax.f32 %v671_v33, 0.0 }
 0x172   : > { %v1032_v41 = vadd.f32 %v1031_v38, %v943_v37  ;;  %v785_v42 = vpack.c.bf16 %v741_v36, %v739_v35 }
 0x173   : > { %v786_v43 = vpack.c.bf16 %v742_v40, %v740_v39 }
 0x174   : > { %1110 = vst [vmem:[%s2037_s16 + $0x8] sm:$0xff] %v1032_v41  ;;  %984 = vmatmul.bf16.gmra.mxu2 %v785_v42 }
 0x175   : > { %1073 = vmatmul.bf16.gmra.mxu3 %v786_v43  ;;  %v584_v44 = vpop.f32.mrf.mxu0 }
 0x176   : > { %v673_v45 = vpop.f32.mrf.mxu1  ;;  %v585_v50 = vadd.f32 %v584_v44, %v1982_v12 }
 0x177   : > { %v945_v46 = vpop.f32.mrf.mxu2  ;;  %v674_v51 = vadd.f32 %v673_v45, %v1984_v13 }
 0x178   : > { %v946_v47 = vadd.f32 %v2032_v21, %v945_v46  ;;  %v1034_v48 = vpop.f32.mrf.mxu3  ;;  %v743_v57 = vmax.f32 %v585_v50, 0.0 }
 0x179   : > { %v744_v61 = vmax.f32 %v674_v51, 0.0 }
 0x17a   : > { %v1035_v49 = vadd.f32 %v1034_v48, %v946_v47 }
 0x17c   : > { %1111 = vst [vmem:[%s2037_s16 + $0x10] sm:$0xff] %v1035_v49 }
 0x17d   : > { %v586_v52 = vpop.f32.mrf.mxu0 }
 0x17e   : > { %v587_v53 = vadd.f32 %v586_v52, %v1982_v12  ;;  %v675_v54 = vpop.f32.mrf.mxu1 }
 0x17f   : > { %v676_v55 = vadd.f32 %v675_v54, %v1984_v13  ;;  %v947_v56 = vpop.f32.mrf.mxu2 }
 0x180   : > { %v745_v58 = vmax.f32 %v587_v53, 0.0  ;;  %v948_v59 = vadd.f32 %v2032_v21, %v947_v56  ;;  %v1036_v60 = vpop.f32.mrf.mxu3 }
 0x181   : > { %v746_v62 = vmax.f32 %v676_v55, 0.0 }
 0x182   : > { %v1037_v63 = vadd.f32 %v1036_v60, %v948_v59  ;;  %v787_v0 = vpack.c.bf16 %v745_v58, %v743_v57 }
 0x183   : > { %v788_v1 = vpack.c.bf16 %v746_v62, %v744_v61 }
 0x184   : > { %1112 = vst [vmem:[%s2037_s16 + $0x18] sm:$0xff] %v1037_v63  ;;  %989 = vmatmul.bf16.gmra.mxu2 %v787_v0 }
 0x185   : > { %1078 = vmatmul.bf16.gmra.mxu3 %v788_v1  ;;  %v589_v2 = vpop.f32.mrf.mxu0 }
 0x186   : > { %v678_v3 = vpop.f32.mrf.mxu1  ;;  %v590_v8 = vadd.f32 %v589_v2, %v1982_v12 }
 0x187   : > { %v950_v4 = vpop.f32.mrf.mxu2  ;;  %v679_v9 = vadd.f32 %v678_v3, %v1984_v13 }
 0x188   : > { %v951_v5 = vadd.f32 %v2032_v21, %v950_v4  ;;  %v1039_v6 = vpop.f32.mrf.mxu3  ;;  %v747_v17 = vmax.f32 %v590_v8, 0.0 }
 0x189   : > { %v748_v22 = vmax.f32 %v679_v9, 0.0 }
 0x18a   : > { %v1040_v7 = vadd.f32 %v1039_v6, %v951_v5 }
 0x18c   : > { %1113 = vst [vmem:[%s2037_s16 + $0x20] sm:$0xff] %v1040_v7 }
 0x18d   : > { %v591_v10 = vpop.f32.mrf.mxu0 }
 0x18e   : > { %v592_v11 = vadd.f32 %v591_v10, %v1982_v12  ;;  %v680_v14 = vpop.f32.mrf.mxu1 }
 0x18f   : > { %v681_v15 = vadd.f32 %v680_v14, %v1984_v13  ;;  %v952_v16 = vpop.f32.mrf.mxu2 }
 0x190   : > { %v749_v18 = vmax.f32 %v592_v11, 0.0  ;;  %v953_v19 = vadd.f32 %v2032_v21, %v952_v16  ;;  %v1041_v20 = vpop.f32.mrf.mxu3 }
 0x191   : > { %v750_v23 = vmax.f32 %v681_v15, 0.0 }
 0x192   : > { %v1042_v24 = vadd.f32 %v1041_v20, %v953_v19  ;;  %v789_v25 = vpack.c.bf16 %v749_v18, %v747_v17 }
 0x193   : > { %v790_v26 = vpack.c.bf16 %v750_v23, %v748_v22 }
 0x194   : > { %1114 = vst [vmem:[%s2037_s16 + $0x28] sm:$0xff] %v1042_v24  ;;  %994 = vmatmul.bf16.gmra.mxu2 %v789_v25 }
 0x195   : > { %1083 = vmatmul.bf16.gmra.mxu3 %v790_v26  ;;  %v594_v27 = vpop.f32.mrf.mxu0 }
 0x196   : > { %v683_v28 = vpop.f32.mrf.mxu1  ;;  %v595_v33 = vadd.f32 %v594_v27, %v1982_v12 }
 0x197   : > { %v955_v29 = vpop.f32.mrf.mxu2  ;;  %v684_v34 = vadd.f32 %v683_v28, %v1984_v13 }
 0x198   : > { %v956_v30 = vadd.f32 %v2032_v21, %v955_v29  ;;  %v1044_v31 = vpop.f32.mrf.mxu3  ;;  %v751_v40 = vmax.f32 %v595_v33, 0.0 }
 0x199   : > { %v752_v44 = vmax.f32 %v684_v34, 0.0 }
 0x19a   : > { %v1045_v32 = vadd.f32 %v1044_v31, %v956_v30 }
 0x19c   : > { %1115 = vst [vmem:[%s2037_s16 + $0x30] sm:$0xff] %v1045_v32 }
 0x19d   : > { %v596_v35 = vpop.f32.mrf.mxu0 }
 0x19e   : > { %v597_v36 = vadd.f32 %v596_v35, %v1982_v12  ;;  %v685_v37 = vpop.f32.mrf.mxu1 }
 0x19f   : > { %v686_v38 = vadd.f32 %v685_v37, %v1984_v13  ;;  %v957_v39 = vpop.f32.mrf.mxu2 }
 0x1a0   : > { %v753_v41 = vmax.f32 %v597_v36, 0.0  ;;  %v958_v42 = vadd.f32 %v2032_v21, %v957_v39  ;;  %v1046_v43 = vpop.f32.mrf.mxu3 }
 0x1a1   : > { %v754_v45 = vmax.f32 %v686_v38, 0.0 }
 0x1a2   : > { %v791_v46 = vpack.c.bf16 %v753_v41, %v751_v40  ;;  %v1047_v47 = vadd.f32 %v1046_v43, %v958_v42 }
 0x1a3   : > { %v792_v48 = vpack.c.bf16 %v754_v45, %v752_v44 }
 0x1a4   : > { %1116 = vst [vmem:[%s2037_s16 + $0x38] sm:$0xff] %v1047_v47  ;;  %999 = vmatmul.bf16.gmra.mxu2 %v791_v46 }
 0x1a5   : > { %1088 = vmatmul.bf16.gmra.mxu3 %v792_v48  ;;  %v599_v49 = vpop.f32.mrf.mxu0 }
 0x1a6   : > { %v688_v50 = vpop.f32.mrf.mxu1  ;;  %v600_v55 = vadd.f32 %v599_v49, %v1982_v12 }
 0x1a7   : > { %v960_v51 = vpop.f32.mrf.mxu2  ;;  %v689_v56 = vadd.f32 %v688_v50, %v1984_v13 }
 0x1a8   : > { %v961_v52 = vadd.f32 %v2032_v21, %v960_v51  ;;  %v1049_v53 = vpop.f32.mrf.mxu3  ;;  %v755_v62 = vmax.f32 %v600_v55, 0.0 }
 0x1a9   : > { %v756_v2 = vmax.f32 %v689_v56, 0.0 }
 0x1aa   : > { %v1050_v54 = vadd.f32 %v1049_v53, %v961_v52 }
 0x1ac   : > { %1117 = vst [vmem:[%s2037_s16 + $0x40] sm:$0xff] %v1050_v54 }
 0x1ad   : > { %v601_v57 = vpop.f32.mrf.mxu0 }
 0x1ae   : > { %v602_v58 = vadd.f32 %v601_v57, %v1982_v12  ;;  %v690_v59 = vpop.f32.mrf.mxu1 }
 0x1af   : > { %v691_v60 = vadd.f32 %v690_v59, %v1984_v13  ;;  %v962_v61 = vpop.f32.mrf.mxu2 }
 0x1b0   : > { %v757_v63 = vmax.f32 %v602_v58, 0.0  ;;  %v963_v0 = vadd.f32 %v2032_v21, %v962_v61  ;;  %v1051_v1 = vpop.f32.mrf.mxu3 }
 0x1b1   : > { %v758_v3 = vmax.f32 %v691_v60, 0.0 }
 0x1b2   : > { %v793_v4 = vpack.c.bf16 %v757_v63, %v755_v62  ;;  %v1052_v5 = vadd.f32 %v1051_v1, %v963_v0 }
 0x1b3   : > { %v794_v6 = vpack.c.bf16 %v758_v3, %v756_v2 }
 0x1b4   : > { %1118 = vst [vmem:[%s2037_s16 + $0x48] sm:$0xff] %v1052_v5  ;;  %1004 = vmatmul.bf16.gmra.mxu2 %v793_v4 }
 0x1b5   : > { %1093 = vmatmul.bf16.gmra.mxu3 %v794_v6  ;;  %v604_v7 = vpop.f32.mrf.mxu0 }
 0x1b6   : > { %v693_v8 = vpop.f32.mrf.mxu1  ;;  %v605_v15 = vadd.f32 %v604_v7, %v1982_v12 }
 0x1b7   : > { %v965_v9 = vpop.f32.mrf.mxu2  ;;  %v694_v16 = vadd.f32 %v693_v8, %v1984_v13 }
 0x1b8   : > { %v966_v10 = vadd.f32 %v2032_v21, %v965_v9  ;;  %v1054_v11 = vpop.f32.mrf.mxu3  ;;  %v759_v23 = vmax.f32 %v605_v15, 0.0 }
 0x1b9   : > { %v760_v27 = vmax.f32 %v694_v16, 0.0 }
 0x1ba   : > { %v1055_v14 = vadd.f32 %v1054_v11, %v966_v10 }
 0x1bc   : > { %1119 = vst [vmem:[%s2037_s16 + $0x50] sm:$0xff] %v1055_v14 }
 0x1bd   : > { %v606_v17 = vpop.f32.mrf.mxu0 }
 0x1be   : > { %v607_v18 = vadd.f32 %v606_v17, %v1982_v12  ;;  %v695_v19 = vpop.f32.mrf.mxu1 }
 0x1bf   : > { %v696_v20 = vadd.f32 %v695_v19, %v1984_v13  ;;  %v967_v22 = vpop.f32.mrf.mxu2 }
 0x1c0   : > { %v761_v24 = vmax.f32 %v607_v18, 0.0  ;;  %v968_v25 = vadd.f32 %v2032_v21, %v967_v22  ;;  %v1056_v26 = vpop.f32.mrf.mxu3 }
 0x1c1   : > { %v762_v28 = vmax.f32 %v696_v20, 0.0 }
 0x1c2   : > { %v795_v29 = vpack.c.bf16 %v761_v24, %v759_v23  ;;  %v1057_v30 = vadd.f32 %v1056_v26, %v968_v25 }
 0x1c3   : > { %v796_v31 = vpack.c.bf16 %v762_v28, %v760_v27 }
 0x1c4   : > { %1120 = vst [vmem:[%s2037_s16 + $0x58] sm:$0xff] %v1057_v30  ;;  %1009 = vmatmul.bf16.gmra.mxu2 %v795_v29 }
 0x1c5   : > { %1098 = vmatmul.bf16.gmra.mxu3 %v796_v31  ;;  %v609_v32 = vpop.f32.mrf.mxu0 }
 0x1c6   : > { %v698_v33 = vpop.f32.mrf.mxu1  ;;  %v610_v38 = vadd.f32 %v609_v32, %v1982_v12 }
 0x1c7   : > { %v970_v34 = vpop.f32.mrf.mxu2  ;;  %v699_v39 = vadd.f32 %v698_v33, %v1984_v13 }
 0x1c8   : > { %v971_v35 = vadd.f32 %v2032_v21, %v970_v34  ;;  %v1059_v36 = vpop.f32.mrf.mxu3  ;;  %v763_v45 = vmax.f32 %v610_v38, 0.0 }
 0x1c9   : > { %v764_v49 = vmax.f32 %v699_v39, 0.0 }
 0x1ca   : > { %v1060_v37 = vadd.f32 %v1059_v36, %v971_v35 }
 0x1cc   : > { %1121 = vst [vmem:[%s2037_s16 + $0x60] sm:$0xff] %v1060_v37 }
 0x1cd   : > { %v611_v40 = vpop.f32.mrf.mxu0 }
 0x1ce   : > { %v612_v41 = vadd.f32 %v611_v40, %v1982_v12  ;;  %v700_v42 = vpop.f32.mrf.mxu1 }
 0x1cf   : > { %v701_v43 = vadd.f32 %v700_v42, %v1984_v13  ;;  %v972_v44 = vpop.f32.mrf.mxu2 }
 0x1d0   : > { %v765_v46 = vmax.f32 %v612_v41, 0.0  ;;  %v973_v47 = vadd.f32 %v2032_v21, %v972_v44  ;;  %v1061_v48 = vpop.f32.mrf.mxu3 }
 0x1d1   : > { %v766_v50 = vmax.f32 %v701_v43, 0.0 }
 0x1d2   : > { %v797_v51 = vpack.c.bf16 %v765_v46, %v763_v45  ;;  %v1062_v52 = vadd.f32 %v1061_v48, %v973_v47 }
 0x1d3   : > { %v798_v53 = vpack.c.bf16 %v766_v50, %v764_v49 }
 0x1d4   : > { %1122 = vst [vmem:[%s2037_s16 + $0x68] sm:$0xff] %v1062_v52  ;;  %1014 = vmatmul.bf16.gmra.mxu2 %v797_v51 }
 0x1d5   : > { %1103 = vmatmul.bf16.gmra.mxu3 %v798_v53 }
 0x1d7   : > { %v975_v12 = vpop.f32.mrf.mxu2 }
 0x1d8   : > { %v976_v13 = vadd.f32 %v2032_v21, %v975_v12  ;;  %v1064_v54 = vpop.f32.mrf.mxu3 }
 0x1da   : > { %v1065_v55 = vadd.f32 %v1064_v54, %v976_v13 }
 0x1dc   : > { %1123 = vst [vmem:[%s2037_s16 + $0x70] sm:$0xff] %v1065_v55 }
 0x1df   : > { %v977_v56 = vpop.f32.mrf.mxu2 }
 0x1e0   : > { %v978_v57 = vadd.f32 %v2032_v21, %v977_v56  ;;  %v1066_v58 = vpop.f32.mrf.mxu3 }
 0x1e2   : > { %v1067_v59 = vadd.f32 %v1066_v58, %v978_v57 }
 0x1e4   : > { %1124 = vst [vmem:[%s2037_s16 + $0x78] sm:$0xff] %v1067_v59 }
 0x1e7   : > { %v980_v60 = vpop.f32.mrf.mxu2 }
 0x1e8   : > { %v981_v61 = vadd.f32 %v2032_v21, %v980_v60  ;;  %v1069_v62 = vpop.f32.mrf.mxu3 }
 0x1ea   : > { %v1070_v63 = vadd.f32 %v1069_v62, %v981_v61 }
 0x1ec   : > { %1125 = vst [vmem:[%s2037_s16 + $0x80] sm:$0xff] %v1070_v63 }
 0x1ef   : > { %v982_v0 = vpop.f32.mrf.mxu2 }
 0x1f0   : > { %v983_v1 = vadd.f32 %v2032_v21, %v982_v0  ;;  %v1071_v2 = vpop.f32.mrf.mxu3 }
 0x1f2   : > { %v1072_v3 = vadd.f32 %v1071_v2, %v983_v1 }
 0x1f4   : > { %1126 = vst [vmem:[%s2037_s16 + $0x88] sm:$0xff] %v1072_v3 }
 0x1f7   : > { %v985_v4 = vpop.f32.mrf.mxu2 }
 0x1f8   : > { %v986_v5 = vadd.f32 %v2032_v21, %v985_v4  ;;  %v1074_v6 = vpop.f32.mrf.mxu3 }
 0x1fa   : > { %v1075_v7 = vadd.f32 %v1074_v6, %v986_v5 }
 0x1fc   : > { %1127 = vst [vmem:[%s2037_s16 + $0x90] sm:$0xff] %v1075_v7 }
 0x1ff   : > { %v987_v8 = vpop.f32.mrf.mxu2 }
 0x200   : > { %v988_v9 = vadd.f32 %v2032_v21, %v987_v8  ;;  %v1076_v10 = vpop.f32.mrf.mxu3 }
 0x202   : > { %v1077_v11 = vadd.f32 %v1076_v10, %v988_v9 }
 0x204   : > { %1128 = vst [vmem:[%s2037_s16 + $0x98] sm:$0xff] %v1077_v11 }
 0x207   : > { %v990_v14 = vpop.f32.mrf.mxu2 }
 0x208   : > { %v991_v15 = vadd.f32 %v2032_v21, %v990_v14  ;;  %v1079_v16 = vpop.f32.mrf.mxu3 }
 0x20a   : > { %v1080_v17 = vadd.f32 %v1079_v16, %v991_v15 }
 0x20c   : > { %1129 = vst [vmem:[%s2037_s16 + $0xa0] sm:$0xff] %v1080_v17 }
 0x20f   : > { %v992_v18 = vpop.f32.mrf.mxu2 }
 0x210   : > { %v993_v19 = vadd.f32 %v2032_v21, %v992_v18  ;;  %v1081_v20 = vpop.f32.mrf.mxu3 }
 0x212   : > { %v1082_v22 = vadd.f32 %v1081_v20, %v993_v19 }
 0x214   : > { %1130 = vst [vmem:[%s2037_s16 + $0xa8] sm:$0xff] %v1082_v22 }
 0x217   : > { %v995_v23 = vpop.f32.mrf.mxu2 }
 0x218   : > { %v996_v24 = vadd.f32 %v2032_v21, %v995_v23  ;;  %v1084_v25 = vpop.f32.mrf.mxu3 }
 0x21a   : > { %v1085_v26 = vadd.f32 %v1084_v25, %v996_v24 }
 0x21c   : > { %1131 = vst [vmem:[%s2037_s16 + $0xb0] sm:$0xff] %v1085_v26 }
 0x21f   : > { %v997_v27 = vpop.f32.mrf.mxu2 }
 0x220   : > { %v998_v28 = vadd.f32 %v2032_v21, %v997_v27  ;;  %v1086_v29 = vpop.f32.mrf.mxu3 }
 0x222   : > { %v1087_v30 = vadd.f32 %v1086_v29, %v998_v28 }
 0x224   : > { %1132 = vst [vmem:[%s2037_s16 + $0xb8] sm:$0xff] %v1087_v30 }
 0x227   : > { %v1000_v31 = vpop.f32.mrf.mxu2 }
 0x228   : > { %v1001_v32 = vadd.f32 %v2032_v21, %v1000_v31  ;;  %v1089_v33 = vpop.f32.mrf.mxu3 }
 0x22a   : > { %v1090_v34 = vadd.f32 %v1089_v33, %v1001_v32 }
 0x22c   : > { %1133 = vst [vmem:[%s2037_s16 + $0xc0] sm:$0xff] %v1090_v34 }
 0x22f   : > { %v1002_v35 = vpop.f32.mrf.mxu2 }
 0x230   : > { %v1003_v36 = vadd.f32 %v2032_v21, %v1002_v35  ;;  %v1091_v37 = vpop.f32.mrf.mxu3 }
 0x232   : > { %v1092_v38 = vadd.f32 %v1091_v37, %v1003_v36 }
 0x234   : > { %1134 = vst [vmem:[%s2037_s16 + $0xc8] sm:$0xff] %v1092_v38 }
 0x237   : > { %v1005_v39 = vpop.f32.mrf.mxu2 }
 0x238   : > { %v1006_v40 = vadd.f32 %v2032_v21, %v1005_v39  ;;  %v1094_v41 = vpop.f32.mrf.mxu3 }
 0x23a   : > { %v1095_v42 = vadd.f32 %v1094_v41, %v1006_v40 }
 0x23c   : > { %1135 = vst [vmem:[%s2037_s16 + $0xd0] sm:$0xff] %v1095_v42 }
 0x23f   : > { %v1007_v43 = vpop.f32.mrf.mxu2 }
 0x240   : > { %v1008_v44 = vadd.f32 %v2032_v21, %v1007_v43  ;;  %v1096_v45 = vpop.f32.mrf.mxu3 }
 0x242   : > { %v1097_v46 = vadd.f32 %v1096_v45, %v1008_v44 }
 0x244   : > { %1136 = vst [vmem:[%s2037_s16 + $0xd8] sm:$0xff] %v1097_v46 }
 0x247   : > { %v1010_v47 = vpop.f32.mrf.mxu2 }
 0x248   : > { %v1011_v48 = vadd.f32 %v2032_v21, %v1010_v47  ;;  %v1099_v49 = vpop.f32.mrf.mxu3 }
 0x24a   : > { %v1100_v50 = vadd.f32 %v1099_v49, %v1011_v48 }
 0x24c   : > { %1137 = vst [vmem:[%s2037_s16 + $0xe0] sm:$0xff] %v1100_v50 }
 0x24f   : > { %v1012_v51 = vpop.f32.mrf.mxu2 }
 0x250   : > { %v1013_v52 = vadd.f32 %v2032_v21, %v1012_v51  ;;  %v1101_v53 = vpop.f32.mrf.mxu3 }
 0x252   : > { %v1102_v12 = vadd.f32 %v1101_v53, %v1013_v52 }
 0x254   : > { %1138 = vst [vmem:[%s2037_s16 + $0xe8] sm:$0xff] %v1102_v12 }
 0x257   : > { %v1015_v13 = vpop.f32.mrf.mxu2 }
 0x258   : > { %v1016_v54 = vadd.f32 %v2032_v21, %v1015_v13  ;;  %v1104_v55 = vpop.f32.mrf.mxu3 }
 0x25a   : > { %v1105_v56 = vadd.f32 %v1104_v55, %v1016_v54 }
 0x25c   : > { %1139 = vst [vmem:[%s2037_s16 + $0xf0] sm:$0xff] %v1105_v56 }
 0x25f   : > { %v1017_v57 = vpop.f32.mrf.mxu2 }
 0x260   : > { %v1018_v58 = vadd.f32 %v2032_v21, %v1017_v57  ;;  %v1106_v59 = vpop.f32.mrf.mxu3 }
 0x262   : > { %v1107_v60 = vadd.f32 %v1106_v59, %v1018_v58 }
 0x264   : > { %1140 = vst [vmem:[%s2037_s16 + $0xf8] sm:$0xff] %v1107_v60 }
 0x265   : > { %1752 = shalt.err (!%p1749_p10)
}
 0x266   : > { %s1808_s17 = smov 128   ;;  %s1809_s28 = smov 8  }
 0x267   : > { %1535 = dma.vmem_to_hbm [thread:$0]  (%p1925_p3), %s1155_s12, 4096, %s1157_s14, %s1142_s15, %s1808_s17, %s1808_s17, %s1809_s28  }
 0x268 PF: > { %s1171_s16 = sand.u32 1, %s1787_s18   ;;  %p2177_p12 = scmp.ge.s32.totalorder %s1799_s21, 2 }
 0x269   : > { %s1172_s23 = scalar_lea.sflag [#allocation4], %s1171_s16 }
 0x26a   : > { %p1552_p13 = pnand %p2177_p12, %p1875_p6 }
 0x26c   : > { %p1553_p0 = pneg %p1552_p13 }
 0x26e   : > { %1782 = dma.done.wait (%p1553_p0), %s1172_s23, 4096  }
 0x26f   : > { %1784 = vsyncadd (%p1553_p0), %s1172_s23, 4294963200  ;;  %p20_p5 = scmp.ge.s32.totalorder %s1912_s30, 4   ;;  %s2178_s18 = smov %s1791_s19 }
 0x270   : > { %s2179_s19 = smov %s1795_s20  ;;  %s2180_s20 = smov %s1921_s9 }
 0x271   : > { %s2181_s21 = smov %s1912_s30  ;;  %22 = sbr.rel (!%p20_p5) target bundleno = 7 (0x7), region = 97 }
 0x276   :  { %1178 = vsyncpa [#allocation3], 1 }
 0x277   :  { %1180 = vsyncpa [#allocation3 + $0x1], 1 }
 0x278   :  { %1181 = vsyncpa [#allocation6], 1 }
 0x279   :  { %1182 = vsyncpa [#allocation9], 1 }
 0x27a   :  { %1183 = vsyncpa [#allocation4], 1 }
 0x27b   :  { %1185 = vsyncpa [#allocation4 + $0x1], 1 }

</bundles_post_ra>
